<compile_context>
chip_gen: v6e
topology: v6e:2x2x1
jax: 0.10.0
libtpu: 0.0.40
codegen_flags: <defaults>
</compile_context>

<pallas_src>
import functools

import jax
import jax.numpy as jnp
from jax import lax
from jax.experimental import pallas as pl
from jax.experimental.pallas import tpu as pltpu

EPS = 1e-3


def _pick_tile(hw, n, c, max_block_elems):
    """Largest TM that divides hw, is a multiple of 128 and keeps one (N, C, TM)
    f32 block under max_block_elems. Falls back to the full hw (legal full-dim block)."""
    best = hw
    tm = 128
    while tm <= hw:
        if hw % tm == 0 and n * c * tm <= max_block_elems:
            best = tm
        tm += 128
    return best


def bn_stats_kernel(x_ref, gamma_ref, beta_ref, scale_ref, shift_ref,
                    sum_ref, sq_ref, *, count):
    # x_ref: (N, C, TM); gamma/beta/scale/shift/sum/sq: (C, 1)
    k = pl.program_id(0)

    @pl.when(k == 0)
    def _():
        sum_ref[...] = jnp.zeros_like(sum_ref)
        sq_ref[...] = jnp.zeros_like(sq_ref)

    x = x_ref[...].astype(jnp.float32)
    # lane reduction first (XLU), then fold the small leading batch axis
    s = jnp.sum(x, axis=2, keepdims=True)        # (N, C, 1)
    sq = jnp.sum(x * x, axis=2, keepdims=True)   # (N, C, 1)
    sum_ref[...] += jnp.sum(s, axis=0)           # (C, 1)
    sq_ref[...] += jnp.sum(sq, axis=0)           # (C, 1)

    @pl.when(k == pl.num_programs(0) - 1)
    def _():
        inv_count = 1.0 / count
        mean = sum_ref[...] * inv_count
        var = sq_ref[...] * inv_count - mean * mean   # biased (training-mode) variance
        inv_std = lax.rsqrt(var + EPS)
        scale = gamma_ref[...] * inv_std
        scale_ref[...] = scale
        shift_ref[...] = beta_ref[...] - mean * scale


def bn_apply_kernel(x_ref, res_ref, scale_ref, shift_ref, o_ref):
    # x_ref/res_ref/o_ref: (N, C, TM); scale/shift: (C, 1)
    x = x_ref[...].astype(jnp.float32)
    res = res_ref[...].astype(jnp.float32)
    scale = scale_ref[...][None]    # (1, C, 1), broadcast over N and lanes
    shift = shift_ref[...][None]
    o_ref[...] = (x * scale + shift + res).astype(o_ref.dtype)


def batchnorm_add(x, res, gamma, beta, *, max_block_elems=256 * 1024):
    """x, res: NCHW float32; gamma/beta: (C,). Training-mode BN (batch stats) + add."""
    N, C, H, W = x.shape
    HW = H * W

    # Free reshapes (no data movement) — no transposes needed.
    x3 = x.reshape(N, C, HW)
    r3 = res.reshape(N, C, HW)
    g = gamma.reshape(C, 1).astype(jnp.float32)
    b = beta.reshape(C, 1).astype(jnp.float32)

    tm = _pick_tile(HW, N, C, max_block_elems)
    kt = HW // tm if HW % tm == 0 else 1  # fallback path uses tm == HW

    stat_spec = pl.BlockSpec((C, 1), lambda k: (0, 0))
    tile_spec = pl.BlockSpec((N, C, tm), lambda k: (0, 0, k))

    # Pass 1: per-channel scale/shift from batch statistics (reduction over grid).
    scale, shift = pl.pallas_call(
        functools.partial(bn_stats_kernel, count=float(N * HW)),
        out_shape=(jax.ShapeDtypeStruct((C, 1), jnp.float32),
                   jax.ShapeDtypeStruct((C, 1), jnp.float32)),
        grid=(kt,),
        in_specs=[tile_spec, stat_spec, stat_spec],
        out_specs=(stat_spec, stat_spec),
        scratch_shapes=[pltpu.VMEM((C, 1), jnp.float32),
                        pltpu.VMEM((C, 1), jnp.float32)],
        compiler_params=pltpu.CompilerParams(dimension_semantics=("arbitrary",)),
    )(x3, g, b)

    # Pass 2: normalize + residual add (parallel over tiles; residual aliased to output).
    out3 = pl.pallas_call(
        bn_apply_kernel,
        out_shape=jax.ShapeDtypeStruct((N, C, HW), x.dtype),
        grid=(kt,),
        in_specs=[tile_spec, tile_spec, stat_spec, stat_spec],
        out_specs=tile_spec,
        input_output_aliases={1: 0},
        compiler_params=pltpu.CompilerParams(dimension_semantics=("parallel",)),
    )(x3, r3, scale, shift)

    return out3.reshape(N, C, H, W)


if __name__ == "__main__":
    key = jax.random.PRNGKey(0)
    k1, k2, k3, k4 = jax.random.split(key, 4)

    # Small shapes consistent with the module: C must be 24 (BN params).
    N, C, H, W = 2, 24, 32, 32
    x24 = jax.random.normal(k1, (N, C, H, W), dtype=jnp.float32)
    x17 = jax.random.normal(k2, (N, C, H, W), dtype=jnp.float32)
    # PyTorch default init is weight=1 / bias=0; random values exercise the affine path.
    gamma = jax.random.normal(k3, (C,), dtype=jnp.float32) * 0.1 + 1.0
    beta = jax.random.normal(k4, (C,), dtype=jnp.float32) * 0.1

    fn = jax.jit(batchnorm_add, static_argnames=("max_block_elems",))

    # Reference: training-mode batch norm (biased var) + residual add.
    mean = jnp.mean(x24, axis=(0, 2, 3), keepdims=True)
    var = jnp.mean((x24 - mean) ** 2, axis=(0, 2, 3), keepdims=True)
    ref = (x24 - mean) / jnp.sqrt(var + EPS) * gamma.reshape(1, C, 1, 1) \
          + beta.reshape(1, C, 1, 1) + x17

    # Default tiling (whole H*W fits in one ~1 MiB block -> grid of 1).
    out = jax.block_until_ready(fn(x24, x17, gamma, beta))
    assert out.shape == x24.shape
    assert jnp.allclose(out, ref, atol=1e-4, rtol=1e-4), "mismatch (default tiling)"

    # Force a multi-tile grid (TM=256 -> 4 grid steps) to exercise the pipelined
    # accumulate/finalize path as well.
    out_tiled = jax.block_until_ready(
        fn(x24, x17, gamma, beta, max_block_elems=N * C * 256))
    assert jnp.allclose(out_tiled, ref, atol=1e-4, rtol=1e-4), "mismatch (tiled path)"

    print("KERNEL_OK")
</pallas_src>

<mosaic_0001>
module attributes {stable_mosaic.version = 11 : i64} {
  func.func @bn_stats_kernel(%arg0: i32, %arg1: memref<2x24x1024xf32, #tpu.memory_space<vmem>>, %arg2: memref<24x1xf32, #tpu.memory_space<vmem>>, %arg3: memref<24x1xf32, #tpu.memory_space<vmem>>, %arg4: memref<24x1xf32, #tpu.memory_space<vmem>>, %arg5: memref<24x1xf32, #tpu.memory_space<vmem>>, %arg6: memref<24x1xf32, #tpu.memory_space<vmem>>, %arg7: memref<24x1xf32, #tpu.memory_space<vmem>>) attributes {dimension_semantics = [#tpu.dimension_semantics<arbitrary>], iteration_bounds = array<i64: 1>, scalar_prefetch = 0 : i64, scratch_operands = 2 : i64, tpu.core_type = #tpu.core_type<tc>, window_params = [{transform_indices = @transform_0, window_bounds = array<i64: 2, 24, 1024>}, {pipeline_mode = #tpu.pipeline_mode<synchronous>, transform_indices = @transform_1, window_bounds = array<i64: 24, 1>}, {pipeline_mode = #tpu.pipeline_mode<synchronous>, transform_indices = @transform_2, window_bounds = array<i64: 24, 1>}, {pipeline_mode = #tpu.pipeline_mode<synchronous>, transform_indices = @transform_3, window_bounds = array<i64: 24, 1>}, {pipeline_mode = #tpu.pipeline_mode<synchronous>, transform_indices = @transform_4, window_bounds = array<i64: 24, 1>}]} {
    %c0_i32 = arith.constant 0 : i32
    %0 = arith.cmpi eq, %arg0, %c0_i32 : i32
    %1 = arith.extui %0 : i1 to i32
    %c0_i32_0 = arith.constant 0 : i32
    %2 = arith.cmpi ne, %1, %c0_i32_0 : i32
    scf.if %2 {
      %cst_16 = arith.constant 0.000000e+00 : f32
      %20 = vector.broadcast %cst_16 : f32 to vector<24x1xf32>
      %c0_17 = arith.constant 0 : index
      %c0_18 = arith.constant 0 : index
      %21 = vector.load %arg6[%c0_17, %c0_18] : memref<24x1xf32, #tpu.memory_space<vmem>>, vector<24x1xf32>
      tpu.vector_store %arg6[%c0_17, %c0_18], %20 {strides = array<i32>} : memref<24x1xf32, #tpu.memory_space<vmem>>, vector<24x1xf32>,
      %cst_19 = arith.constant 0.000000e+00 : f32
      %22 = vector.broadcast %cst_19 : f32 to vector<24x1xf32>
      %c0_20 = arith.constant 0 : index
      %c0_21 = arith.constant 0 : index
      %23 = vector.load %arg7[%c0_20, %c0_21] : memref<24x1xf32, #tpu.memory_space<vmem>>, vector<24x1xf32>
      tpu.vector_store %arg7[%c0_20, %c0_21], %22 {strides = array<i32>} : memref<24x1xf32, #tpu.memory_space<vmem>>, vector<24x1xf32>,
    } else {
    }
    %c0 = arith.constant 0 : index
    %c0_1 = arith.constant 0 : index
    %c0_2 = arith.constant 0 : index
    %3 = vector.load %arg1[%c0, %c0_1, %c0_2] : memref<2x24x1024xf32, #tpu.memory_space<vmem>>, vector<2x24x1024xf32>
    %cst = arith.constant dense<0.000000e+00> : vector<2x24xf32>
    %4 = vector.multi_reduction <add>, %3, %cst [2] : vector<2x24x1024xf32> to vector<2x24xf32>
    %5 = vector.shape_cast %4 : vector<2x24xf32> to vector<2x24x1xf32>
    %6 = arith.mulf %3, %3 : vector<2x24x1024xf32>
    %cst_3 = arith.constant dense<0.000000e+00> : vector<2x24xf32>
    %7 = vector.multi_reduction <add>, %6, %cst_3 [2] : vector<2x24x1024xf32> to vector<2x24xf32>
    %8 = vector.shape_cast %7 : vector<2x24xf32> to vector<2x24x1xf32>
    %c0_4 = arith.constant 0 : index
    %c0_5 = arith.constant 0 : index
    %9 = vector.load %arg6[%c0_4, %c0_5] : memref<24x1xf32, #tpu.memory_space<vmem>>, vector<24x1xf32>
    %cst_6 = arith.constant dense<0.000000e+00> : vector<24x1xf32>
    %10 = vector.multi_reduction <add>, %5, %cst_6 [0] : vector<2x24x1xf32> to vector<24x1xf32>
    %11 = arith.addf %9, %10 : vector<24x1xf32>
    %c0_7 = arith.constant 0 : index
    %c0_8 = arith.constant 0 : index
    %12 = vector.load %arg6[%c0_7, %c0_8] : memref<24x1xf32, #tpu.memory_space<vmem>>, vector<24x1xf32>
    tpu.vector_store %arg6[%c0_7, %c0_8], %11 {strides = array<i32>} : memref<24x1xf32, #tpu.memory_space<vmem>>, vector<24x1xf32>,
    %c0_9 = arith.constant 0 : index
    %c0_10 = arith.constant 0 : index
    %13 = vector.load %arg7[%c0_9, %c0_10] : memref<24x1xf32, #tpu.memory_space<vmem>>, vector<24x1xf32>
    %cst_11 = arith.constant dense<0.000000e+00> : vector<24x1xf32>
    %14 = vector.multi_reduction <add>, %8, %cst_11 [0] : vector<2x24x1xf32> to vector<24x1xf32>
    %15 = arith.addf %13, %14 : vector<24x1xf32>
    %c0_12 = arith.constant 0 : index
    %c0_13 = arith.constant 0 : index
    %16 = vector.load %arg7[%c0_12, %c0_13] : memref<24x1xf32, #tpu.memory_space<vmem>>, vector<24x1xf32>
    tpu.vector_store %arg7[%c0_12, %c0_13], %15 {strides = array<i32>} : memref<24x1xf32, #tpu.memory_space<vmem>>, vector<24x1xf32>,
    %c0_i32_14 = arith.constant 0 : i32
    %17 = arith.cmpi eq, %arg0, %c0_i32_14 : i32
    %18 = arith.extui %17 : i1 to i32
    %c0_i32_15 = arith.constant 0 : i32
    %19 = arith.cmpi ne, %18, %c0_i32_15 : i32
    scf.if %19 {
      %c0_16 = arith.constant 0 : index
      %c0_17 = arith.constant 0 : index
      %20 = vector.load %arg6[%c0_16, %c0_17] : memref<24x1xf32, #tpu.memory_space<vmem>>, vector<24x1xf32>
      %cst_18 = arith.constant 4.8828125E-4 : f32
      %21 = vector.broadcast %cst_18 : f32 to vector<24x1xf32>
      %22 = arith.mulf %20, %21 : vector<24x1xf32>
      %c0_19 = arith.constant 0 : index
      %c0_20 = arith.constant 0 : index
      %23 = vector.load %arg7[%c0_19, %c0_20] : memref<24x1xf32, #tpu.memory_space<vmem>>, vector<24x1xf32>
      %cst_21 = arith.constant 4.8828125E-4 : f32
      %24 = vector.broadcast %cst_21 : f32 to vector<24x1xf32>
      %25 = arith.mulf %23, %24 : vector<24x1xf32>
      %26 = arith.mulf %22, %22 : vector<24x1xf32>
      %27 = arith.subf %25, %26 : vector<24x1xf32>
      %cst_22 = arith.constant 1.000000e-03 : f32
      %28 = vector.broadcast %cst_22 : f32 to vector<24x1xf32>
      %29 = arith.addf %27, %28 : vector<24x1xf32>
      %30 = math.rsqrt %29 : vector<24x1xf32>
      %c0_23 = arith.constant 0 : index
      %c0_24 = arith.constant 0 : index
      %31 = vector.load %arg2[%c0_23, %c0_24] : memref<24x1xf32, #tpu.memory_space<vmem>>, vector<24x1xf32>
      %32 = arith.mulf %31, %30 : vector<24x1xf32>
      %c0_25 = arith.constant 0 : index
      %c0_26 = arith.constant 0 : index
      %33 = vector.load %arg4[%c0_25, %c0_26] : memref<24x1xf32, #tpu.memory_space<vmem>>, vector<24x1xf32>
      tpu.vector_store %arg4[%c0_25, %c0_26], %32 {strides = array<i32>} : memref<24x1xf32, #tpu.memory_space<vmem>>, vector<24x1xf32>,
      %c0_27 = arith.constant 0 : index
      %c0_28 = arith.constant 0 : index
      %34 = vector.load %arg3[%c0_27, %c0_28] : memref<24x1xf32, #tpu.memory_space<vmem>>, vector<24x1xf32>
      %35 = arith.mulf %22, %32 : vector<24x1xf32>
      %36 = arith.subf %34, %35 : vector<24x1xf32>
      %c0_29 = arith.constant 0 : index
      %c0_30 = arith.constant 0 : index
      %37 = vector.load %arg5[%c0_29, %c0_30] : memref<24x1xf32, #tpu.memory_space<vmem>>, vector<24x1xf32>
      tpu.vector_store %arg5[%c0_29, %c0_30], %36 {strides = array<i32>} : memref<24x1xf32, #tpu.memory_space<vmem>>, vector<24x1xf32>,
    } else {
    }
    return
  }
  func.func @transform_0(%arg0: i32) -> (i32, i32, i32) {
    %c0_i32 = arith.constant 0 : i32
    %c0_i32_0 = arith.constant 0 : i32
    %c0_i32_1 = arith.constant 0 : i32
    return %c0_i32, %c0_i32_0, %arg0 : i32, i32, i32
  }
  func.func @transform_1(%arg0: i32) -> (i32, i32) {
    %c0_i32 = arith.constant 0 : i32
    %c0_i32_0 = arith.constant 0 : i32
    %c0_i32_1 = arith.constant 0 : i32
    return %c0_i32, %c0_i32_0 : i32, i32
  }
  func.func @transform_2(%arg0: i32) -> (i32, i32) {
    %c0_i32 = arith.constant 0 : i32
    %c0_i32_0 = arith.constant 0 : i32
    %c0_i32_1 = arith.constant 0 : i32
    return %c0_i32, %c0_i32_0 : i32, i32
  }
  func.func @transform_3(%arg0: i32) -> (i32, i32) {
    %c0_i32 = arith.constant 0 : i32
    %c0_i32_0 = arith.constant 0 : i32
    %c0_i32_1 = arith.constant 0 : i32
    return %c0_i32, %c0_i32_0 : i32, i32
  }
  func.func @transform_4(%arg0: i32) -> (i32, i32) {
    %c0_i32 = arith.constant 0 : i32
    %c0_i32_0 = arith.constant 0 : i32
    %c0_i32_1 = arith.constant 0 : i32
    return %c0_i32, %c0_i32_0 : i32, i32
  }
}

module attributes {stable_mosaic.version = 11 : i64} {
  func.func @bn_apply_kernel(%arg0: i32, %arg1: memref<2x24x1024xf32, #tpu.memory_space<vmem>>, %arg2: memref<2x24x1024xf32, #tpu.memory_space<vmem>>, %arg3: memref<24x1xf32, #tpu.memory_space<vmem>>, %arg4: memref<24x1xf32, #tpu.memory_space<vmem>>, %arg5: memref<2x24x1024xf32, #tpu.memory_space<vmem>>) attributes {dimension_semantics = [#tpu.dimension_semantics<parallel>], iteration_bounds = array<i64: 1>, scalar_prefetch = 0 : i64, scratch_operands = 0 : i64, tpu.core_type = #tpu.core_type<tc>, window_params = [{transform_indices = @transform_0, window_bounds = array<i64: 2, 24, 1024>}, {transform_indices = @transform_1, window_bounds = array<i64: 2, 24, 1024>}, {pipeline_mode = #tpu.pipeline_mode<synchronous>, transform_indices = @transform_2, window_bounds = array<i64: 24, 1>}, {pipeline_mode = #tpu.pipeline_mode<synchronous>, transform_indices = @transform_3, window_bounds = array<i64: 24, 1>}, {transform_indices = @transform_4, window_bounds = array<i64: 2, 24, 1024>}]} {
    %c0 = arith.constant 0 : index
    %c0_0 = arith.constant 0 : index
    %c0_1 = arith.constant 0 : index
    %0 = vector.load %arg1[%c0, %c0_0, %c0_1] : memref<2x24x1024xf32, #tpu.memory_space<vmem>>, vector<2x24x1024xf32>
    %c0_2 = arith.constant 0 : index
    %c0_3 = arith.constant 0 : index
    %c0_4 = arith.constant 0 : index
    %1 = vector.load %arg2[%c0_2, %c0_3, %c0_4] : memref<2x24x1024xf32, #tpu.memory_space<vmem>>, vector<2x24x1024xf32>
    %c0_5 = arith.constant 0 : index
    %c0_6 = arith.constant 0 : index
    %2 = vector.load %arg3[%c0_5, %c0_6] : memref<24x1xf32, #tpu.memory_space<vmem>>, vector<24x1xf32>
    %3 = vector.shape_cast %2 : vector<24x1xf32> to vector<1x24x1xf32>
    %c0_7 = arith.constant 0 : index
    %c0_8 = arith.constant 0 : index
    %4 = vector.load %arg4[%c0_7, %c0_8] : memref<24x1xf32, #tpu.memory_space<vmem>>, vector<24x1xf32>
    %5 = vector.shape_cast %4 : vector<24x1xf32> to vector<1x24x1xf32>
    %6 = vector.broadcast %3 : vector<1x24x1xf32> to vector<2x24x1024xf32>
    %7 = arith.mulf %0, %6 : vector<2x24x1024xf32>
    %8 = vector.broadcast %5 : vector<1x24x1xf32> to vector<2x24x1024xf32>
    %9 = arith.addf %7, %8 : vector<2x24x1024xf32>
    %10 = arith.addf %9, %1 : vector<2x24x1024xf32>
    %c0_9 = arith.constant 0 : index
    %c0_10 = arith.constant 0 : index
    %c0_11 = arith.constant 0 : index
    %11 = vector.load %arg5[%c0_9, %c0_10, %c0_11] : memref<2x24x1024xf32, #tpu.memory_space<vmem>>, vector<2x24x1024xf32>
    tpu.vector_store %arg5[%c0_9, %c0_10, %c0_11], %10 {strides = array<i32>} : memref<2x24x1024xf32, #tpu.memory_space<vmem>>, vector<2x24x1024xf32>,
    return
  }
  func.func @transform_0(%arg0: i32) -> (i32, i32, i32) {
    %c0_i32 = arith.constant 0 : i32
    %c0_i32_0 = arith.constant 0 : i32
    %c0_i32_1 = arith.constant 0 : i32
    return %c0_i32, %c0_i32_0, %arg0 : i32, i32, i32
  }
  func.func @transform_1(%arg0: i32) -> (i32, i32, i32) {
    %c0_i32 = arith.constant 0 : i32
    %c0_i32_0 = arith.constant 0 : i32
    %c0_i32_1 = arith.constant 0 : i32
    return %c0_i32, %c0_i32_0, %arg0 : i32, i32, i32
  }
  func.func @transform_2(%arg0: i32) -> (i32, i32) {
    %c0_i32 = arith.constant 0 : i32
    %c0_i32_0 = arith.constant 0 : i32
    %c0_i32_1 = arith.constant 0 : i32
    return %c0_i32, %c0_i32_0 : i32, i32
  }
  func.func @transform_3(%arg0: i32) -> (i32, i32) {
    %c0_i32 = arith.constant 0 : i32
    %c0_i32_0 = arith.constant 0 : i32
    %c0_i32_1 = arith.constant 0 : i32
    return %c0_i32, %c0_i32_0 : i32, i32
  }
  func.func @transform_4(%arg0: i32) -> (i32, i32, i32) {
    %c0_i32 = arith.constant 0 : i32
    %c0_i32_0 = arith.constant 0 : i32
    %c0_i32_1 = arith.constant 0 : i32
    return %c0_i32, %c0_i32_0, %arg0 : i32, i32, i32
  }
}

</mosaic_0001>

<bundles_post_ra>
// kernel: batchnorm_add.2
= control target key start
LH: loop header
LB: loop body
LE: loop exit
PB: predicated region body
PF: predicated region fallthrough
CT: control target
= control target key end

     0   :  { %vm20_vm0 = vcmask 7168   ;;  %s680_s0 = inlined_call_operand.vmem [shape: f32[2,24,1024], index: 0, kind: input, shape index: {}]   ;;  %s681_s1 = inlined_call_operand.vmem [shape: f32[24,1], index: 1, kind: input, shape index: {}]   ;;  %s682_s2 = inlined_call_operand.vmem [shape: f32[24,1], index: 2, kind: input, shape index: {}]   ;;  %s683_s3 = inlined_call_operand.vmem [shape: f32[24,1], index: 3, kind: output, shape index: {0}]   ;;  %s684_s4 = inlined_call_operand.vmem [shape: f32[24,1], index: 4, kind: output, shape index: {1}]  }
   0x1   :  { %v43_v0 = vld [vmem:[%s680_s0 + $0x80] sm:$0xff]  ;;  %v44_v1 = vld [vmem:[%s680_s0 + $0x88] sm:$0xff]  ;;  %v45_v2 = vld [vmem:[%s680_s0 + $0x90] sm:$0xff] }
   0x2   :  { %v93_v3 = vadd.f32 %v44_v1, %v43_v0  ;;  %v46_v4 = vld [vmem:[%s680_s0 + $0x98] sm:$0xff]  ;;  %v357_v5 = vmul.f32 %v43_v0, %v43_v0  ;;  %v27_v6 = vld [vmem:[%s680_s0] sm:$0xff]  ;;  %v365_v9 = vmul.f32 %v44_v1, %v44_v1  ;;  %v367_v10 = vmul.f32 %v45_v2, %v45_v2  ;;  %v28_v11 = vld [vmem:[%s680_s0 + $0x8] sm:$0xff] }
   0x3   :  { %v47_v7 = vld [vmem:[%s680_s0 + $0xa0] sm:$0xff]  ;;  %v29_v12 = vld [vmem:[%s680_s0 + $0x10] sm:$0xff]  ;;  %v129_v13 = vmul.f32 %v27_v6, %v27_v6  ;;  %v48_v14 = vld [vmem:[%s680_s0 + $0xa8] sm:$0xff]  ;;  %v381_v16 = vmul.f32 %v46_v4, %v46_v4  ;;  %v75_v19 = vadd.f32 %v28_v11, %v27_v6  ;;  %v130_v20 = vmul.f32 %v28_v11, %v28_v11 }
   0x4   :  { %v94_v8 = vadd.f32 %v93_v3, %v45_v2  ;;  %v49_v15 = vld [vmem:[%s680_s0 + $0xb0] sm:$0xff]  ;;  %v383_v17 = vmul.f32 %v47_v7, %v47_v7  ;;  %v30_v18 = vld [vmem:[%s680_s0 + $0x18] sm:$0xff]  ;;  %v388_v22 = vmul.f32 %v48_v14, %v48_v14  ;;  %v31_v24 = vld [vmem:[%s680_s0 + $0x20] sm:$0xff]  ;;  %v131_v25 = vmul.f32 %v29_v12, %v29_v12 }
   0x5   :  { %v390_v23 = vmul.f32 %v49_v15, %v49_v15  ;;  %v51_v26 = vld [vmem:[%s680_s0 + $0xc0] sm:$0xff]  ;;  %v52_v27 = vld [vmem:[%s680_s0 + $0xc8] sm:$0xff]  ;;  %v33_v29 = vld [vmem:[%s680_s0 + $0x30] sm:$0xff]  ;;  %v76_v30 = vadd.f32 %v75_v19, %v29_v12  ;;  %v132_v31 = vmul.f32 %v30_v18, %v30_v18  ;;  %v407_v32 = vmul.f32 %v31_v24, %v31_v24 }
   0x6   :  { %v95_v21 = vadd.f32 %v94_v8, %v46_v4  ;;  %v32_v28 = vld [vmem:[%s680_s0 + $0x28] sm:$0xff]  ;;  %v53_v33 = vld [vmem:[%s680_s0 + $0xd0] sm:$0xff]  ;;  %v102_v34 = vadd.f32 %v52_v27, %v51_v26  ;;  %v34_v36 = vld [vmem:[%s680_s0 + $0x38] sm:$0xff]  ;;  %v417_v38 = vmul.f32 %v33_v29, %v33_v29  ;;  %v177_v40 = vadd.f32 %v130_v20, %v129_v13 }
   0x7   :  { %v415_v37 = vmul.f32 %v32_v28, %v32_v28  ;;  %v54_v39 = vld [vmem:[%s680_s0 + $0xd8] sm:$0xff]  ;;  %v77_v41 = vadd.f32 %v76_v30, %v30_v18  ;;  %v422_v42 = vmul.f32 %v34_v36, %v34_v36  ;;  %v35_v44 = vld [vmem:[%s680_s0 + $0x40] sm:$0xff]  ;;  %v36_v45 = vld [vmem:[%s680_s0 + $0x48] sm:$0xff]  ;;  %v433_v47 = vmul.f32 %v51_v26, %v51_v26 }
   0x8   :  { %v96_v35 = vadd.f32 %v95_v21, %v47_v7  ;;  %v103_v43 = vadd.f32 %v102_v34, %v53_v33  ;;  %v37_v46 = vld [vmem:[%s680_s0 + $0x50] sm:$0xff]  ;;  %v438_v49 = vld [vmem:[%s680_s0 + $0xe0] sm:$0xff]  ;;  %v84_v50 = vadd.f32 %v36_v45, %v35_v44  ;;  %v137_v51 = vmul.f32 %v35_v44, %v35_v44  ;;  %v443_v53 = vld [vmem:[%s680_s0 + $0xb8] sm:$0xff] }
   0x9   :  { %v138_v52 = vmul.f32 %v36_v45, %v36_v45  ;;  %v78_v54 = vadd.f32 %v77_v41, %v31_v24  ;;  %v38_v56 = vld [vmem:[%s680_s0 + $0x58] sm:$0xff]  ;;  %v451_v57 = vld [vmem:[%s680_s0 + $0x140] sm:$0xff]  ;;  %v154_v58 = vmul.f32 %v52_v27, %v52_v27  ;;  %v453_v59 = vmul.f32 %v53_v33, %v53_v33  ;;  %v458_v61 = vld [vmem:[%s680_s0 + $0xe8] sm:$0xff] }
   0xa   :  { %v97_v48 = vadd.f32 %v96_v35, %v48_v14  ;;  %v104_v55 = vadd.f32 %v103_v43, %v54_v39  ;;  %v85_v62 = vadd.f32 %v84_v50, %v37_v46  ;;  %v463_v63 = vld [vmem:[%s680_s0 + $0x148] sm:$0xff]  ;;  %v468_v0 = vld [vmem:[%s680_s0 + $0x150] sm:$0xff]  ;;  %v139_v1 = vmul.f32 %v37_v46, %v37_v46  ;;  %v39_v7 = vld [vmem:[%s680_s0 + $0x60] sm:$0xff] }
   0xb   :  { %v178_v2 = vadd.f32 %v177_v40, %v131_v25  ;;  %v79_v3 = vadd.f32 %v78_v54, %v32_v28  ;;  %v473_v4 = vld [vmem:[%s680_s0 + $0xf0] sm:$0xff]  ;;  %v120_v8 = vadd.f32 %v463_v63, %v451_v57  ;;  %v481_v11 = vmul.f32 %v54_v39, %v54_v39  ;;  %v487_v14 = vld [vmem:[%s680_s0 + $0x158] sm:$0xff]  ;;  %v497_v18 = vld [vmem:[%s680_s0 + $0x108] sm:$0xff] }
   0xc   :  { %v98_v60 = vadd.f32 %v97_v48, %v49_v15  ;;  %v105_v6 = vadd.f32 %v104_v55, %v438_v49  ;;  %v86_v13 = vadd.f32 %v85_v62, %v38_v56  ;;  %v492_v15 = vld [vmem:[%s680_s0 + $0x100] sm:$0xff]  ;;  %v140_v19 = vmul.f32 %v38_v56, %v38_v56  ;;  %v40_v25 = vld [vmem:[%s680_s0 + $0x68] sm:$0xff]  ;;  %v507_v27 = vld [vmem:[%s680_s0 + $0x110] sm:$0xff] }
   0xd   :  { %v186_v20 = vadd.f32 %v138_v52, %v137_v51  ;;  %v80_v21 = vadd.f32 %v79_v3, %v33_v29  ;;  %v121_v26 = vadd.f32 %v120_v8, %v468_v0  ;;  %v111_v28 = vadd.f32 %v497_v18, %v492_v15  ;;  %v58_v29 = vld [vmem:[%s680_s0 + $0xf8] sm:$0xff]  ;;  %v517_v33 = vld [vmem:[%s680_s0 + $0x160] sm:$0xff]  ;;  %v41_v44 = vld [vmem:[%s680_s0 + $0x70] sm:$0xff] }
   0xe   :  { %v99_v12 = vadd.f32 %v98_v60, %v443_v53  ;;  %v106_v24 = vadd.f32 %v105_v6, %v458_v61  ;;  %v87_v30 = vadd.f32 %v86_v13, %v39_v7  ;;  %v522_v34 = vld [vmem:[%s680_s0 + $0x118] sm:$0xff]  ;;  %v141_v35 = vmul.f32 %v39_v7, %v39_v7  ;;  %v533_v50 = vld [vmem:[%s680_s0 + $0x168] sm:$0xff] }
   0xf   :  { %v187_v39 = vadd.f32 %v186_v20, %v139_v1  ;;  %v179_v40 = vadd.f32 %v178_v2, %v132_v31  ;;  %v81_v41 = vadd.f32 %v80_v21, %v34_v36  ;;  %v122_v45 = vadd.f32 %v121_v26, %v487_v14  ;;  %v538_v31 = vld [vmem:[%s680_s0 + $0x120] sm:$0xff]  ;;  %v42_v55 = vld [vmem:[%s680_s0 + $0x78] sm:$0xff]  ;;  %v549_v2 = vld [vmem:[%s680_s0 + $0x170] sm:$0xff] }
  0x10   :  { %100 = vadd.xlane.f32.xlu1 %v99_v12  ;;  %v107_v43 = vadd.f32 %v106_v24, %v473_v4  ;;  %v112_v46 = vadd.f32 %v111_v28, %v507_v27  ;;  %v88_v48 = vadd.f32 %v87_v30, %v40_v25  ;;  %v142_v36 = vmul.f32 %v40_v25, %v40_v25  ;;  %v565_v21 = vld [vmem:[%s680_s0 + $0x178] sm:$0xff] }
  0x11   :  { %v188_v51 = vadd.f32 %v187_v39, %v140_v19  ;;  %v180_v52 = vadd.f32 %v179_v40, %v407_v32  ;;  %82 = vadd.xlane.f32.xlu0 %v81_v41  ;;  %v123_v56 = vadd.f32 %v122_v45, %v517_v33  ;;  %v143_v62 = vmul.f32 %v41_v44, %v41_v44  ;;  %v554_v32 = vld [vmem:[%s680_s0 + $0x128] sm:$0xff]  ;;  %v66_v28 = vld [vmem:[%s680_s0 + $0x138] sm:$0xff] }
  0x12   :  { %v108_v54 = vadd.f32 %v107_v43, %v58_v29  ;;  %v113_v60 = vadd.f32 %v112_v46, %v522_v34  ;;  %v89_v1 = vadd.f32 %v88_v48, %v41_v44  ;;  %v144_v3 = vmul.f32 %v42_v55, %v42_v55 }
  0x13   :  { %v189_v6 = vadd.f32 %v188_v51, %v141_v35  ;;  %v181_v7 = vadd.f32 %v180_v52, %v415_v37  ;;  %v124_v8 = vadd.f32 %v123_v56, %v533_v50  ;;  %v204_v13 = vadd.f32 %v154_v58, %v433_v47  ;;  %v570_v37 = vld [vmem:[%s680_s0 + $0x130] sm:$0xff] }
  0x14   :  { %109 = vadd.xlane.f32.xlu1 %v108_v54  ;;  %v114_v12 = vadd.f32 %v113_v60, %v538_v31  ;;  %v195_v19 = vadd.f32 %v365_v9, %v357_v5  ;;  %v90_v20 = vadd.f32 %v89_v1, %v42_v55  ;;  %v157_v25 = vmul.f32 %v438_v49, %v438_v49 }
  0x15   :  { %v190_v24 = vadd.f32 %v189_v6, %v142_v36  ;;  %v158_v47 = vmul.f32 %v458_v61, %v458_v61  ;;  %v125_v5 = vadd.f32 %v124_v8, %v549_v2  ;;  %v205_v58 = vadd.f32 %v204_v13, %v453_v59 }
  0x16   :  { %v115_v9 = vadd.f32 %v114_v12, %v554_v32  ;;  %v196_v26 = vadd.f32 %v195_v19, %v367_v10  ;;  %91 = vadd.xlane.f32.xlu0 %v90_v20  ;;  %v182_v35 = vadd.f32 %v181_v7, %v417_v38  ;;  %v169_v49 = vmul.f32 %v451_v57, %v451_v57 }
  0x17   :  { %v191_v30 = vadd.f32 %v190_v24, %v143_v62  ;;  %v170_v61 = vmul.f32 %v463_v63, %v463_v63  ;;  %v126_v39 = vadd.f32 %v125_v5, %v565_v21  ;;  %v206_v10 = vadd.f32 %v205_v58, %v481_v11 }
  0x18   :  { %v116_v59 = vadd.f32 %v115_v9, %v570_v37  ;;  %v197_v40 = vadd.f32 %v196_v26, %v381_v16  ;;  %v152_v41 = vmul.f32 %v443_v53, %v443_v53  ;;  %v159_v38 = vmul.f32 %v473_v4, %v473_v4 }
  0x19   :  { %v160_v43 = vmul.f32 %v58_v29, %v58_v29  ;;  %v171_v57 = vmul.f32 %v468_v0, %v468_v0  ;;  %127 = vadd.xlane.f32.xlu1 %v126_v39  ;;  %v192_v44 = vadd.f32 %v191_v30, %v144_v3  ;;  %v207_v45 = vadd.f32 %v206_v10, %v157_v25 }
  0x1a   :  { %v117_v63 = vadd.f32 %v116_v59, %v66_v28  ;;  %v198_v46 = vadd.f32 %v197_v40, %v383_v17  ;;  %v172_v11 = vmul.f32 %v487_v14, %v487_v14  ;;  %v222_v16 = vadd.f32 %v170_v61, %v169_v49 }
  0x1b   :  { %v161_v53 = vmul.f32 %v492_v15, %v492_v15  ;;  %v162_v4 = vmul.f32 %v497_v18, %v497_v18  ;;  %v183_v29 = vadd.f32 %v182_v35, %v422_v42  ;;  %v208_v0 = vadd.f32 %v207_v45, %v158_v47 }
  0x1c   :  { %118 = vadd.xlane.f32.xlu0 %v117_v63  ;;  %v199_v48 = vadd.f32 %v198_v46, %v388_v22  ;;  %v163_v36 = vmul.f32 %v507_v27, %v507_v27  ;;  %v173_v17 = vmul.f32 %v517_v33, %v517_v33  ;;  %v223_v14 = vadd.f32 %v222_v16, %v171_v57 }
  0x1d   :  { %193 = vadd.xlane.f32.xlu1 %v192_v44  ;;  %v209_v51 = vadd.f32 %v208_v0, %v159_v38  ;;  %v164_v18 = vmul.f32 %v522_v34, %v522_v34  ;;  %v213_v52 = vadd.f32 %v162_v4, %v161_v53  ;;  %v174_v42 = vmul.f32 %v533_v50, %v533_v50 }
  0x1e   :  { %v200_v15 = vadd.f32 %v199_v48, %v390_v23  ;;  %v224_v54 = vadd.f32 %v223_v14, %v172_v11  ;;  %v165_v33 = vmul.f32 %v538_v31, %v538_v31  ;;  %v319_v56 = vmov 0.0  }
  0x1f   :  { %v210_v22 = vadd.f32 %v209_v51, %v160_v43  ;;  %v214_v55 = vadd.f32 %v213_v52, %v163_v36  ;;  %21 = vst.msk [vmem:[#allocation2] sm:$0xff] %vm20_vm0, %v319_v56  ;;  %22 = vst.msk [vmem:[#allocation2 + $0x8] sm:$0xff] %vm20_vm0, %v319_v56  ;;  %v175_v23 = vmul.f32 %v549_v2, %v549_v2 }
  0x20   :  { %184 = vadd.xlane.f32.xlu0 %v183_v29  ;;  %v201_v27 = vadd.f32 %v200_v15, %v152_v41  ;;  %23 = vst.msk [vmem:[#allocation2 + $0x10] sm:$0xff] %vm20_vm0, %v319_v56  ;;  %24 = vst.msk [vmem:[#allocation3] sm:$0xff] %vm20_vm0, %v319_v56  ;;  %v225_v34 = vadd.f32 %v224_v54, %v173_v17  ;;  %v166_v50 = vmul.f32 %v554_v32, %v554_v32 }
  0x21   :  { %25 = vst.msk [vmem:[#allocation3 + $0x8] sm:$0xff] %vm20_vm0, %v319_v56  ;;  %26 = vst.msk [vmem:[#allocation3 + $0x10] sm:$0xff] %vm20_vm0, %v319_v56  ;;  %211 = vadd.xlane.f32.xlu1 %v210_v22  ;;  %v215_v31 = vadd.f32 %v214_v55, %v164_v18  ;;  %v176_v60 = vmul.f32 %v565_v21, %v565_v21  ;;  %v167_v1 = vmul.f32 %v570_v37, %v570_v37 }
  0x22   :  { %v226_v62 = vadd.f32 %v225_v34, %v174_v42  ;;  %v168_v7 = vmul.f32 %v66_v28, %v66_v28  ;;  %v283_v34 = vld [vmem:[%s681_s1] sm:$0xff] }
  0x23   :  { %v216_v3 = vadd.f32 %v215_v31, %v165_v33 }
  0x24   :  { %202 = vadd.xlane.f32.xlu0 %v201_v27  ;;  %v227_v6 = vadd.f32 %v226_v62, %v175_v23 }
  0x25   :  { %v217_v8 = vadd.f32 %v216_v3, %v166_v50  ;;  %v285_v3 = vld [vmem:[%s681_s1 + $0x10] sm:$0xff] }
  0x26   :  { %v228_v12 = vadd.f32 %v227_v6, %v176_v60  ;;  %v231_v20 = vld [vmem:[#allocation2] sm:$0xff]  ;;  %v232_v58 = vld [vmem:[#allocation2 + $0x8] sm:$0xff] }
  0x27   :  { %v218_v2 = vadd.f32 %v217_v8, %v167_v1  ;;  %v233_v5 = vld [vmem:[#allocation2 + $0x10] sm:$0xff]  ;;  %v244_v39 = vld [vmem:[#allocation3] sm:$0xff]  ;;  %v292_v60 = vld [vmem:[%s682_s2] sm:$0xff] }
  0x28   :  { %229 = vadd.xlane.f32.xlu1 %v228_v12  ;;  %v246_v43 = vld [vmem:[#allocation3 + $0x10] sm:$0xff]  ;;  %v245_v46 = vld [vmem:[#allocation3 + $0x8] sm:$0xff]  ;;  %v294_v12 = vld [vmem:[%s682_s2 + $0x10] sm:$0xff] }
  0x29   :  { %v219_v13 = vadd.f32 %v218_v2, %v168_v7  ;;  %v284_v8 = vld [vmem:[%s681_s1 + $0x8] sm:$0xff] }
  0x2b   :  { %220 = vadd.xlane.f32.xlu0 %v219_v13 }
  0x99   :  { %v101_v19 = vpop.xlane.xlu1 %100 }
  0x9a   :  { %v83_v32 = vpop.xlane.xlu0 %82 }
  0x9d   :  { %v110_v24 = vpop.xlane.xlu1 %109 }
  0x9e   :  { %v234_v25 = vadd.f32 %v110_v24, %v83_v32 }
  0x9f   :  { %v92_v47 = vpop.xlane.xlu0 %91 }
  0xa0   :  { %v237_v21 = vadd.f32 %v234_v25, %v231_v20  ;;  %v293_v20 = vld [vmem:[%s682_s2 + $0x8] sm:$0xff] }
  0xa2   :  { %241 = vst.msk [vmem:[#allocation2] sm:$0xff] %vm20_vm0, %v237_v21  ;;  %v128_v37 = vpop.xlane.xlu1 %127 }
  0xa3   :  { %v236_v9 = vadd.f32 %v128_v37, %v101_v19 }
  0xa5   :  { %v119_v26 = vpop.xlane.xlu0 %118  ;;  %v239_v28 = vadd.f32 %v236_v9, %v233_v5 }
  0xa6   :  { %v235_v30 = vadd.f32 %v119_v26, %v92_v47  ;;  %v194_v35 = vpop.xlane.xlu1 %193 }
  0xa7   :  { %243 = vst.msk [vmem:[#allocation2 + $0x10] sm:$0xff] %vm20_vm0, %v239_v28 }
  0xa8   :  { %v238_v49 = vadd.f32 %v235_v30, %v232_v58 }
  0xa9   :  { %v185_v61 = vpop.xlane.xlu0 %184  ;;  %v259_v38 = vld [vmem:[#allocation2] sm:$0xff] }
  0xaa   :  { %242 = vst.msk [vmem:[#allocation2 + $0x8] sm:$0xff] %vm20_vm0, %v238_v49  ;;  %v212_v59 = vpop.xlane.xlu1 %211  ;;  %v262_v44 = vmul.f32 0.00048828125, %v259_v38 }
  0xab   :  { %v247_v10 = vadd.f32 %v212_v59, %v185_v61 }
  0xac   :  { %v271_v4 = vmul.f32 %v262_v44, %v262_v44 }
  0xad   :  { %v250_v40 = vadd.f32 %v247_v10, %v244_v39  ;;  %v203_v41 = vpop.xlane.xlu0 %202 }
  0xae   :  { %v261_v29 = vld [vmem:[#allocation2 + $0x10] sm:$0xff] }
  0xaf   :  { %253 = vst.msk [vmem:[#allocation3] sm:$0xff] %vm20_vm0, %v250_v40  ;;  %v264_v17 = vmul.f32 0.00048828125, %v261_v29 }
  0xb1   :  { %v230_v57 = vpop.xlane.xlu1 %229  ;;  %v260_v14 = vld [vmem:[#allocation2 + $0x8] sm:$0xff]  ;;  %v273_v52 = vmul.f32 %v264_v17, %v264_v17 }
  0xb2   :  { %v249_v63 = vadd.f32 %v230_v57, %v203_v41  ;;  %v263_v15 = vmul.f32 0.00048828125, %v260_v14 }
  0xb4   :  { %v252_v45 = vadd.f32 %v249_v63, %v246_v43  ;;  %v221_v11 = vpop.xlane.xlu0 %220  ;;  %v272_v27 = vmul.f32 %v263_v15, %v263_v15 }
  0xb5   :  { %v248_v16 = vadd.f32 %v221_v11, %v194_v35 }
  0xb6   :  { %v265_v53 = vld [vmem:[#allocation3] sm:$0xff]  ;;  %255 = vst.msk [vmem:[#allocation3 + $0x10] sm:$0xff] %vm20_vm0, %v252_v45 }
  0xb7   :  { %v268_v0 = vmul.f32 0.00048828125, %v265_v53  ;;  %v251_v48 = vadd.f32 %v248_v16, %v245_v46 }
  0xb9   :  { %v274_v36 = vsub.f32 %v268_v0, %v271_v4  ;;  %254 = vst.msk [vmem:[#allocation3 + $0x8] sm:$0xff] %vm20_vm0, %v251_v48 }
  0xbb   :  { %v277_v51 = vadd.f32 0.001, %v274_v36 }
  0xbd   :  { %313 = vrsqrt.f32 %v277_v51  ;;  %v267_v18 = vld [vmem:[#allocation3 + $0x10] sm:$0xff] }
  0xbe   :  { %v270_v42 = vmul.f32 0.00048828125, %v267_v18 }
  0xc0   :  { %v276_v54 = vsub.f32 %v270_v42, %v273_v52  ;;  %v266_v22 = vld [vmem:[#allocation3 + $0x8] sm:$0xff] }
  0xc1   :  { %v269_v33 = vmul.f32 0.00048828125, %v266_v22 }
  0xc2   :  { %v279_v55 = vadd.f32 0.001, %v276_v54 }
  0xc3   :  { %v275_v56 = vsub.f32 %v269_v33, %v272_v27 }
  0xc4   :  { %315 = vrsqrt.f32 %v279_v55 }
  0xc5   :  { %v278_v23 = vadd.f32 0.001, %v275_v56 }
  0xc7   :  { %317 = vrsqrt.f32 %v278_v23 }
  0xca   :  { %v314_v50 = vpop.eup %313 }
  0xcb   :  { %v286_v31 = vmul.f32 %v314_v50, %v283_v34 }
  0xcd   :  { %289 = vst.msk [vmem:[%s683_s3] sm:$0xff] %vm20_vm0, %v286_v31  ;;  %v295_v62 = vmul.f32 %v286_v31, %v262_v44 }
  0xcf   :  { %v298_v1 = vsub.f32 %v292_v60, %v295_v62 }
  0xd1   :  { %v316_v6 = vpop.eup %315  ;;  %301 = vst.msk [vmem:[%s684_s4] sm:$0xff] %vm20_vm0, %v298_v1 }
  0xd2   :  { %v288_v7 = vmul.f32 %v316_v6, %v285_v3 }
  0xd4   :  { %v318_v2 = vpop.eup %317  ;;  %291 = vst.msk [vmem:[%s683_s3 + $0x10] sm:$0xff] %vm20_vm0, %v288_v7  ;;  %v297_v13 = vmul.f32 %v288_v7, %v264_v17 }
  0xd5   :  { %v287_v19 = vmul.f32 %v318_v2, %v284_v8 }
  0xd6   :  { %v300_v32 = vsub.f32 %v294_v12, %v297_v13 }
  0xd7   :  { %290 = vst.msk [vmem:[%s683_s3 + $0x8] sm:$0xff] %vm20_vm0, %v287_v19  ;;  %v296_v24 = vmul.f32 %v287_v19, %v263_v15 }
  0xd8   :  { %303 = vst.msk [vmem:[%s684_s4 + $0x10] sm:$0xff] %vm20_vm0, %v300_v32 }
  0xd9   :  { %v299_v25 = vsub.f32 %v293_v20, %v296_v24 }
  0xdb   :  { %302 = vst.msk [vmem:[%s684_s4 + $0x8] sm:$0xff] %vm20_vm0, %v299_v25 }

// kernel: batchnorm_add.3
= control target key start
LH: loop header
LB: loop body
LE: loop exit
PB: predicated region body
PF: predicated region fallthrough
CT: control target
= control target key end

     0   :  { %v348_v0 = vmov 0   ;;  %s860_s2 = inlined_call_operand.vmem [shape: f32[24,1], index: 2, kind: input, shape index: {}]   ;;  %s861_s3 = inlined_call_operand.vmem [shape: f32[24,1], index: 3, kind: input, shape index: {}]   ;;  %s862_s0 = inlined_call_operand.vmem [shape: f32[2,24,1024], index: 0, kind: input, shape index: {}]   ;;  %s863_s1 = inlined_call_operand.vmem [shape: f32[2,24,1024], index: 1, kind: input, shape index: {}, may-alias: {1,4}]   ;;  %s864_s4 = inlined_call_operand.vmem [shape: f32[2,24,1024], index: 4, kind: output, shape index: {}, may-alias: {1,4}]  }
   0x1   :  { %347 = vset.pattern.permute.xlu1 %v348_v0  ;;  %346 = vset.pattern.permute.xlu0 %v348_v0  ;;  %v115_v1 = vld [vmem:[%s860_s2 + $0x10] sm:$0xff]  ;;  %v113_v2 = vld [vmem:[%s860_s2] sm:$0xff]  ;;  %v114_v4 = vld [vmem:[%s860_s2 + $0x8] sm:$0xff] }
   0x2   :  { %131 = vperm.xlu1 %347, %v115_v1   ;;  %121 = vperm.xlu0 %346, %v113_v2   ;;  %v116_v3 = vld [vmem:[%s861_s3] sm:$0xff]  ;;  %v118_v5 = vld [vmem:[%s861_s3 + $0x10] sm:$0xff]  ;;  %v117_v6 = vld [vmem:[%s861_s3 + $0x8] sm:$0xff] }
   0x3   :  { %v17_v7 = vld [vmem:[%s862_s0] sm:$0xff]  ;;  %v18_v8 = vld [vmem:[%s862_s0 + $0x8] sm:$0xff]  ;;  %v19_v9 = vld [vmem:[%s862_s0 + $0x10] sm:$0xff] }
   0x4   :  { %v20_v10 = vld [vmem:[%s862_s0 + $0x18] sm:$0xff]  ;;  %v21_v11 = vld [vmem:[%s862_s0 + $0x20] sm:$0xff]  ;;  %v22_v12 = vld [vmem:[%s862_s0 + $0x28] sm:$0xff] }
   0x5   :  { %v23_v13 = vld [vmem:[%s862_s0 + $0x30] sm:$0xff]  ;;  %v24_v14 = vld [vmem:[%s862_s0 + $0x38] sm:$0xff]  ;;  %v41_v15 = vld [vmem:[%s862_s0 + $0xc0] sm:$0xff] }
   0x6   :  { %184 = vperm.xlu1 %347, %v116_v3   ;;  %126 = vperm.xlu0 %346, %v114_v4   ;;  %v42_v16 = vld [vmem:[%s862_s0 + $0xc8] sm:$0xff]  ;;  %v43_v19 = vld [vmem:[%s862_s0 + $0xd0] sm:$0xff]  ;;  %v44_v20 = vld [vmem:[%s862_s0 + $0xd8] sm:$0xff] }
   0x7   :  { %v45_v21 = vld [vmem:[%s862_s0 + $0xe0] sm:$0xff]  ;;  %v46_v22 = vld [vmem:[%s862_s0 + $0xe8] sm:$0xff]  ;;  %v47_v23 = vld [vmem:[%s862_s0 + $0xf0] sm:$0xff] }
   0x8   :  { %v48_v24 = vld [vmem:[%s862_s0 + $0xf8] sm:$0xff]  ;;  %v65_v42 = vld [vmem:[%s863_s1] sm:$0xff]  ;;  %v66_v43 = vld [vmem:[%s863_s1 + $0x8] sm:$0xff] }
   0x9   :  { %v67_v44 = vld [vmem:[%s863_s1 + $0x10] sm:$0xff]  ;;  %v68_v45 = vld [vmem:[%s863_s1 + $0x18] sm:$0xff]  ;;  %v69_v46 = vld [vmem:[%s863_s1 + $0x20] sm:$0xff] }
   0xa   :  { %194 = vperm.xlu1 %347, %v118_v5   ;;  %189 = vperm.xlu0 %346, %v117_v6   ;;  %v70_v47 = vld [vmem:[%s863_s1 + $0x28] sm:$0xff]  ;;  %v71_v48 = vld [vmem:[%s863_s1 + $0x30] sm:$0xff]  ;;  %v72_v49 = vld [vmem:[%s863_s1 + $0x38] sm:$0xff] }
   0xb   :  { %v89_v54 = vld [vmem:[%s863_s1 + $0xc0] sm:$0xff]  ;;  %v90_v55 = vld [vmem:[%s863_s1 + $0xc8] sm:$0xff]  ;;  %v91_v56 = vld [vmem:[%s863_s1 + $0xd0] sm:$0xff] }
   0xc   :  { %v92_v61 = vld [vmem:[%s863_s1 + $0xd8] sm:$0xff]  ;;  %v93_v62 = vld [vmem:[%s863_s1 + $0xe0] sm:$0xff]  ;;  %v94_v63 = vld [vmem:[%s863_s1 + $0xe8] sm:$0xff] }
   0xd   :  { %v95_v4 = vld [vmem:[%s863_s1 + $0xf0] sm:$0xff]  ;;  %v96_v5 = vld [vmem:[%s863_s1 + $0xf8] sm:$0xff] }
  0x7d   :  { %v422_v17 = vpop.permute.xlu1 %131  ;;  %v122_v18 = vpop.permute.xlu0 %121 }
  0x7e   :  { %v134_v25 = vmul.f32 %v122_v18, %v17_v7  ;;  %v135_v26 = vmul.f32 %v122_v18, %v18_v8  ;;  %v136_v27 = vmul.f32 %v122_v18, %v19_v9  ;;  %v137_v28 = vmul.f32 %v122_v18, %v20_v10  ;;  %v33_v10 = vld [vmem:[%s862_s0 + $0x80] sm:$0xff] }
  0x7f   :  { %v138_v29 = vmul.f32 %v122_v18, %v21_v11  ;;  %v139_v30 = vmul.f32 %v122_v18, %v22_v12  ;;  %v140_v31 = vmul.f32 %v122_v18, %v23_v13  ;;  %v141_v32 = vmul.f32 %v122_v18, %v24_v14 }
  0x80   :  { %v158_v33 = vmul.f32 %v122_v18, %v41_v15  ;;  %v159_v34 = vmul.f32 %v122_v18, %v42_v16  ;;  %v160_v35 = vmul.f32 %v122_v18, %v43_v19  ;;  %v161_v36 = vmul.f32 %v122_v18, %v44_v20  ;;  %v34_v15 = vld [vmem:[%s862_s0 + $0x88] sm:$0xff]  ;;  %v35_v16 = vld [vmem:[%s862_s0 + $0x90] sm:$0xff] }
  0x81   :  { %v162_v37 = vmul.f32 %v122_v18, %v45_v21  ;;  %v163_v38 = vmul.f32 %v122_v18, %v46_v22  ;;  %v164_v39 = vmul.f32 %v122_v18, %v47_v23  ;;  %v165_v40 = vmul.f32 %v122_v18, %v48_v24  ;;  %v185_v41 = vpop.permute.xlu1 %184  ;;  %v36_v18 = vld [vmem:[%s862_s0 + $0x98] sm:$0xff]  ;;  %v37_v23 = vld [vmem:[%s862_s0 + $0xa0] sm:$0xff]  ;;  %v38_v24 = vld [vmem:[%s862_s0 + $0xa8] sm:$0xff] }
  0x82   :  { %v197_v50 = vadd.f32 %v185_v41, %v134_v25  ;;  %v198_v51 = vadd.f32 %v185_v41, %v135_v26  ;;  %v199_v52 = vadd.f32 %v185_v41, %v136_v27  ;;  %v200_v53 = vadd.f32 %v185_v41, %v137_v28  ;;  %v39_v25 = vld [vmem:[%s862_s0 + $0xb0] sm:$0xff] }
  0x83   :  { %v201_v57 = vadd.f32 %v185_v41, %v138_v29  ;;  %v202_v58 = vadd.f32 %v185_v41, %v139_v30  ;;  %v203_v59 = vadd.f32 %v185_v41, %v140_v31  ;;  %v204_v60 = vadd.f32 %v185_v41, %v141_v32  ;;  %v40_v30 = vld [vmem:[%s862_s0 + $0xb8] sm:$0xff]  ;;  %v57_v31 = vld [vmem:[%s862_s0 + $0x140] sm:$0xff]  ;;  %v58_v32 = vld [vmem:[%s862_s0 + $0x148] sm:$0xff] }
  0x84   :  { %v221_v0 = vadd.f32 %v185_v41, %v158_v33  ;;  %v222_v1 = vadd.f32 %v185_v41, %v159_v34  ;;  %v223_v2 = vadd.f32 %v185_v41, %v160_v35  ;;  %v224_v3 = vadd.f32 %v185_v41, %v161_v36 }
  0x85   :  { %v225_v6 = vadd.f32 %v185_v41, %v162_v37  ;;  %v226_v7 = vadd.f32 %v185_v41, %v163_v38  ;;  %v227_v8 = vadd.f32 %v185_v41, %v164_v39  ;;  %v228_v9 = vadd.f32 %v185_v41, %v165_v40  ;;  %v59_v37 = vld [vmem:[%s862_s0 + $0x150] sm:$0xff]  ;;  %v60_v38 = vld [vmem:[%s862_s0 + $0x158] sm:$0xff]  ;;  %v61_v39 = vld [vmem:[%s862_s0 + $0x160] sm:$0xff] }
  0x86   :  { %v245_v11 = vadd.f32 %v197_v50, %v65_v42  ;;  %v246_v12 = vadd.f32 %v198_v51, %v66_v43  ;;  %v247_v13 = vadd.f32 %v199_v52, %v67_v44  ;;  %v248_v14 = vadd.f32 %v200_v53, %v68_v45  ;;  %v62_v40 = vld [vmem:[%s862_s0 + $0x168] sm:$0xff]  ;;  %v63_v41 = vld [vmem:[%s862_s0 + $0x170] sm:$0xff]  ;;  %v64_v42 = vld [vmem:[%s862_s0 + $0x178] sm:$0xff] }
  0x87   :  { %v249_v19 = vadd.f32 %v201_v57, %v69_v46  ;;  %v250_v20 = vadd.f32 %v202_v58, %v70_v47  ;;  %v251_v21 = vadd.f32 %v203_v59, %v71_v48  ;;  %v252_v22 = vadd.f32 %v204_v60, %v72_v49  ;;  %v195_v47 = vpop.permute.xlu1 %194 }
  0x88   :  { %v269_v26 = vadd.f32 %v221_v0, %v89_v54  ;;  %v270_v27 = vadd.f32 %v222_v1, %v90_v55  ;;  %v271_v28 = vadd.f32 %v223_v2, %v91_v56  ;;  %v272_v29 = vadd.f32 %v224_v3, %v92_v61  ;;  %293 = vst [vmem:[%s864_s4] sm:$0xff] %v245_v11 }
  0x89   :  { %294 = vst [vmem:[%s864_s4 + $0x8] sm:$0xff] %v246_v12  ;;  %295 = vst [vmem:[%s864_s4 + $0x10] sm:$0xff] %v247_v13  ;;  %v273_v33 = vadd.f32 %v225_v6, %v93_v62  ;;  %v274_v34 = vadd.f32 %v226_v7, %v94_v63  ;;  %v275_v35 = vadd.f32 %v227_v8, %v95_v4 }
  0x8a   :  { %296 = vst [vmem:[%s864_s4 + $0x18] sm:$0xff] %v248_v14  ;;  %v276_v36 = vadd.f32 %v228_v9, %v96_v5  ;;  %297 = vst [vmem:[%s864_s4 + $0x20] sm:$0xff] %v249_v19  ;;  %v150_v43 = vmul.f32 %v422_v17, %v33_v10  ;;  %v151_v44 = vmul.f32 %v422_v17, %v34_v15 }
  0x8b   :  { %298 = vst [vmem:[%s864_s4 + $0x28] sm:$0xff] %v250_v20  ;;  %299 = vst [vmem:[%s864_s4 + $0x30] sm:$0xff] %v251_v21  ;;  %v152_v45 = vmul.f32 %v422_v17, %v35_v16  ;;  %v153_v46 = vmul.f32 %v422_v17, %v36_v18  ;;  %v154_v48 = vmul.f32 %v422_v17, %v37_v23 }
  0x8c   :  { %300 = vst [vmem:[%s864_s4 + $0x38] sm:$0xff] %v252_v22  ;;  %317 = vst [vmem:[%s864_s4 + $0xc0] sm:$0xff] %v269_v26  ;;  %v155_v49 = vmul.f32 %v422_v17, %v38_v24  ;;  %v156_v50 = vmul.f32 %v422_v17, %v39_v25  ;;  %v157_v51 = vmul.f32 %v422_v17, %v40_v30  ;;  %v644_v22 = vpop.permute.xlu0 %126 }
  0x8d   :  { %318 = vst [vmem:[%s864_s4 + $0xc8] sm:$0xff] %v270_v27  ;;  %319 = vst [vmem:[%s864_s4 + $0xd0] sm:$0xff] %v271_v28  ;;  %v174_v52 = vmul.f32 %v422_v17, %v57_v31  ;;  %v175_v53 = vmul.f32 %v422_v17, %v58_v32  ;;  %v176_v54 = vmul.f32 %v422_v17, %v59_v37 }
  0x8e   :  { %320 = vst [vmem:[%s864_s4 + $0xd8] sm:$0xff] %v272_v29  ;;  %321 = vst [vmem:[%s864_s4 + $0xe0] sm:$0xff] %v273_v33  ;;  %v177_v55 = vmul.f32 %v422_v17, %v60_v38  ;;  %v178_v60 = vmul.f32 %v422_v17, %v61_v39  ;;  %v179_v61 = vmul.f32 %v422_v17, %v62_v40  ;;  %v25_v29 = vld [vmem:[%s862_s0 + $0x40] sm:$0xff] }
  0x8f   :  { %322 = vst [vmem:[%s864_s4 + $0xe8] sm:$0xff] %v274_v34  ;;  %323 = vst [vmem:[%s864_s4 + $0xf0] sm:$0xff] %v275_v35  ;;  %v180_v62 = vmul.f32 %v422_v17, %v63_v41  ;;  %v181_v63 = vmul.f32 %v422_v17, %v64_v42  ;;  %v213_v4 = vadd.f32 %v195_v47, %v150_v43  ;;  %v26_v34 = vld [vmem:[%s862_s0 + $0x48] sm:$0xff]  ;;  %v27_v35 = vld [vmem:[%s862_s0 + $0x50] sm:$0xff] }
  0x90   :  { %324 = vst [vmem:[%s864_s4 + $0xf8] sm:$0xff] %v276_v36  ;;  %v214_v5 = vadd.f32 %v195_v47, %v151_v44  ;;  %v215_v6 = vadd.f32 %v195_v47, %v152_v45  ;;  %v216_v17 = vadd.f32 %v195_v47, %v153_v46  ;;  %v217_v10 = vadd.f32 %v195_v47, %v154_v48  ;;  %v28_v36 = vld [vmem:[%s862_s0 + $0x58] sm:$0xff]  ;;  %v29_v41 = vld [vmem:[%s862_s0 + $0x60] sm:$0xff]  ;;  %v30_v42 = vld [vmem:[%s862_s0 + $0x68] sm:$0xff] }
  0x91   :  { %v218_v11 = vadd.f32 %v195_v47, %v155_v49  ;;  %v219_v12 = vadd.f32 %v195_v47, %v156_v50  ;;  %v220_v13 = vadd.f32 %v195_v47, %v157_v51  ;;  %v237_v18 = vadd.f32 %v195_v47, %v174_v52  ;;  %v31_v43 = vld [vmem:[%s862_s0 + $0x70] sm:$0xff]  ;;  %v32_v48 = vld [vmem:[%s862_s0 + $0x78] sm:$0xff]  ;;  %v49_v49 = vld [vmem:[%s862_s0 + $0x100] sm:$0xff] }
  0x92   :  { %v238_v19 = vadd.f32 %v195_v47, %v175_v53  ;;  %v239_v20 = vadd.f32 %v195_v47, %v176_v54  ;;  %v240_v21 = vadd.f32 %v195_v47, %v177_v55  ;;  %v241_v25 = vadd.f32 %v195_v47, %v178_v60  ;;  %v50_v50 = vld [vmem:[%s862_s0 + $0x108] sm:$0xff]  ;;  %v51_v55 = vld [vmem:[%s862_s0 + $0x110] sm:$0xff]  ;;  %v56_v60 = vld [vmem:[%s862_s0 + $0x138] sm:$0xff] }
  0x93   :  { %v242_v26 = vadd.f32 %v195_v47, %v179_v61  ;;  %v243_v27 = vadd.f32 %v195_v47, %v180_v62  ;;  %v244_v28 = vadd.f32 %v195_v47, %v181_v63  ;;  %v142_v61 = vmul.f32 %v644_v22, %v25_v29 }
  0x94   :  { %v143_v62 = vmul.f32 %v644_v22, %v26_v34  ;;  %v144_v63 = vmul.f32 %v644_v22, %v27_v35 }
  0x97   :  { %v81_v56 = vld [vmem:[%s863_s1 + $0x80] sm:$0xff]  ;;  %v82_v57 = vld [vmem:[%s863_s1 + $0x88] sm:$0xff]  ;;  %v83_v58 = vld [vmem:[%s863_s1 + $0x90] sm:$0xff] }
  0x98   :  { %v84_v59 = vld [vmem:[%s863_s1 + $0x98] sm:$0xff]  ;;  %v85_v0 = vld [vmem:[%s863_s1 + $0xa0] sm:$0xff]  ;;  %v86_v1 = vld [vmem:[%s863_s1 + $0xa8] sm:$0xff]  ;;  %v261_v30 = vadd.f32 %v213_v4, %v81_v56  ;;  %v262_v31 = vadd.f32 %v214_v5, %v82_v57  ;;  %v263_v32 = vadd.f32 %v215_v6, %v83_v58  ;;  %v148_v4 = vmul.f32 %v644_v22, %v31_v43 }
  0x99   :  { %v87_v2 = vld [vmem:[%s863_s1 + $0xb0] sm:$0xff]  ;;  %v88_v3 = vld [vmem:[%s863_s1 + $0xb8] sm:$0xff]  ;;  %v105_v7 = vld [vmem:[%s863_s1 + $0x140] sm:$0xff]  ;;  %v264_v33 = vadd.f32 %v216_v17, %v84_v59  ;;  %v265_v37 = vadd.f32 %v217_v10, %v85_v0  ;;  %v266_v38 = vadd.f32 %v218_v11, %v86_v1  ;;  %v145_v0 = vmul.f32 %v644_v22, %v28_v36  ;;  %v190_v1 = vpop.permute.xlu0 %189 }
  0x9a   :  { %v106_v8 = vld [vmem:[%s863_s1 + $0x148] sm:$0xff]  ;;  %v107_v9 = vld [vmem:[%s863_s1 + $0x150] sm:$0xff]  ;;  %v108_v14 = vld [vmem:[%s863_s1 + $0x158] sm:$0xff]  ;;  %v267_v39 = vadd.f32 %v219_v12, %v87_v2  ;;  %v268_v40 = vadd.f32 %v220_v13, %v88_v3  ;;  %v285_v44 = vadd.f32 %v237_v18, %v105_v7  ;;  %v146_v2 = vmul.f32 %v644_v22, %v29_v41 }
  0x9b   :  { %v109_v15 = vld [vmem:[%s863_s1 + $0x160] sm:$0xff]  ;;  %v110_v16 = vld [vmem:[%s863_s1 + $0x168] sm:$0xff]  ;;  %v111_v23 = vld [vmem:[%s863_s1 + $0x170] sm:$0xff]  ;;  %v286_v45 = vadd.f32 %v238_v19, %v106_v8  ;;  %v287_v46 = vadd.f32 %v239_v20, %v107_v9  ;;  %v288_v47 = vadd.f32 %v240_v21, %v108_v14  ;;  %v147_v3 = vmul.f32 %v644_v22, %v30_v42 }
  0x9c   :  { %v112_v24 = vld [vmem:[%s863_s1 + $0x178] sm:$0xff]  ;;  %v289_v51 = vadd.f32 %v241_v25, %v109_v15  ;;  %v290_v52 = vadd.f32 %v242_v26, %v110_v16  ;;  %v291_v53 = vadd.f32 %v243_v27, %v111_v23  ;;  %v53_v57 = vld [vmem:[%s862_s0 + $0x120] sm:$0xff]  ;;  %v54_v58 = vld [vmem:[%s862_s0 + $0x128] sm:$0xff]  ;;  %v149_v5 = vmul.f32 %v644_v22, %v32_v48 }
  0x9d   :  { %309 = vst [vmem:[%s864_s4 + $0x80] sm:$0xff] %v261_v30  ;;  %310 = vst [vmem:[%s864_s4 + $0x88] sm:$0xff] %v262_v31  ;;  %v292_v54 = vadd.f32 %v244_v28, %v112_v24  ;;  %v52_v56 = vld [vmem:[%s862_s0 + $0x118] sm:$0xff]  ;;  %v55_v59 = vld [vmem:[%s862_s0 + $0x130] sm:$0xff]  ;;  %v166_v6 = vmul.f32 %v644_v22, %v49_v49  ;;  %v167_v17 = vmul.f32 %v644_v22, %v50_v50 }
  0x9e   :  { %311 = vst [vmem:[%s864_s4 + $0x90] sm:$0xff] %v263_v32  ;;  %312 = vst [vmem:[%s864_s4 + $0x98] sm:$0xff] %v264_v33  ;;  %v168_v7 = vmul.f32 %v644_v22, %v51_v55  ;;  %v169_v8 = vmul.f32 %v644_v22, %v52_v56  ;;  %v170_v10 = vmul.f32 %v644_v22, %v53_v57 }
  0x9f   :  { %313 = vst [vmem:[%s864_s4 + $0xa0] sm:$0xff] %v265_v37  ;;  %314 = vst [vmem:[%s864_s4 + $0xa8] sm:$0xff] %v266_v38  ;;  %v171_v11 = vmul.f32 %v644_v22, %v54_v58  ;;  %v172_v12 = vmul.f32 %v644_v22, %v55_v59  ;;  %v173_v13 = vmul.f32 %v644_v22, %v56_v60 }
  0xa0   :  { %315 = vst [vmem:[%s864_s4 + $0xb0] sm:$0xff] %v267_v39  ;;  %316 = vst [vmem:[%s864_s4 + $0xb8] sm:$0xff] %v268_v40  ;;  %v205_v18 = vadd.f32 %v190_v1, %v142_v61  ;;  %v206_v19 = vadd.f32 %v190_v1, %v143_v62  ;;  %v207_v20 = vadd.f32 %v190_v1, %v144_v63 }
  0xa1   :  { %333 = vst [vmem:[%s864_s4 + $0x140] sm:$0xff] %v285_v44  ;;  %334 = vst [vmem:[%s864_s4 + $0x148] sm:$0xff] %v286_v45  ;;  %v208_v21 = vadd.f32 %v190_v1, %v145_v0  ;;  %v209_v25 = vadd.f32 %v190_v1, %v146_v2  ;;  %v210_v26 = vadd.f32 %v190_v1, %v147_v3 }
  0xa2   :  { %335 = vst [vmem:[%s864_s4 + $0x150] sm:$0xff] %v287_v46  ;;  %336 = vst [vmem:[%s864_s4 + $0x158] sm:$0xff] %v288_v47  ;;  %v211_v27 = vadd.f32 %v190_v1, %v148_v4  ;;  %v212_v28 = vadd.f32 %v190_v1, %v149_v5  ;;  %v229_v32 = vadd.f32 %v190_v1, %v166_v6 }
  0xa3   :  { %337 = vst [vmem:[%s864_s4 + $0x160] sm:$0xff] %v289_v51  ;;  %338 = vst [vmem:[%s864_s4 + $0x168] sm:$0xff] %v290_v52  ;;  %v230_v33 = vadd.f32 %v190_v1, %v167_v17  ;;  %v231_v34 = vadd.f32 %v190_v1, %v168_v7  ;;  %v232_v35 = vadd.f32 %v190_v1, %v169_v8 }
  0xa4   :  { %339 = vst [vmem:[%s864_s4 + $0x170] sm:$0xff] %v291_v53  ;;  %340 = vst [vmem:[%s864_s4 + $0x178] sm:$0xff] %v292_v54  ;;  %v233_v39 = vadd.f32 %v190_v1, %v170_v10  ;;  %v234_v40 = vadd.f32 %v190_v1, %v171_v11  ;;  %v235_v41 = vadd.f32 %v190_v1, %v172_v12 }
  0xa5   :  { %v236_v42 = vadd.f32 %v190_v1, %v173_v13 }
  0xab   :  { %v73_v9 = vld [vmem:[%s863_s1 + $0x40] sm:$0xff]  ;;  %v74_v14 = vld [vmem:[%s863_s1 + $0x48] sm:$0xff]  ;;  %v75_v15 = vld [vmem:[%s863_s1 + $0x50] sm:$0xff] }
  0xac   :  { %v76_v16 = vld [vmem:[%s863_s1 + $0x58] sm:$0xff]  ;;  %v77_v22 = vld [vmem:[%s863_s1 + $0x60] sm:$0xff]  ;;  %v78_v23 = vld [vmem:[%s863_s1 + $0x68] sm:$0xff]  ;;  %v253_v46 = vadd.f32 %v205_v18, %v73_v9  ;;  %v254_v47 = vadd.f32 %v206_v19, %v74_v14  ;;  %v255_v48 = vadd.f32 %v207_v20, %v75_v15 }
  0xad   :  { %v79_v24 = vld [vmem:[%s863_s1 + $0x70] sm:$0xff]  ;;  %v80_v29 = vld [vmem:[%s863_s1 + $0x78] sm:$0xff]  ;;  %v97_v30 = vld [vmem:[%s863_s1 + $0x100] sm:$0xff]  ;;  %v256_v49 = vadd.f32 %v208_v21, %v76_v16  ;;  %v257_v50 = vadd.f32 %v209_v25, %v77_v22  ;;  %v258_v51 = vadd.f32 %v210_v26, %v78_v23 }
  0xae   :  { %v98_v31 = vld [vmem:[%s863_s1 + $0x108] sm:$0xff]  ;;  %v99_v36 = vld [vmem:[%s863_s1 + $0x110] sm:$0xff]  ;;  %v100_v37 = vld [vmem:[%s863_s1 + $0x118] sm:$0xff]  ;;  %v259_v52 = vadd.f32 %v211_v27, %v79_v24  ;;  %v260_v53 = vadd.f32 %v212_v28, %v80_v29  ;;  %v277_v54 = vadd.f32 %v229_v32, %v97_v30 }
  0xaf   :  { %v101_v38 = vld [vmem:[%s863_s1 + $0x120] sm:$0xff]  ;;  %v102_v43 = vld [vmem:[%s863_s1 + $0x128] sm:$0xff]  ;;  %v103_v44 = vld [vmem:[%s863_s1 + $0x130] sm:$0xff]  ;;  %v278_v55 = vadd.f32 %v230_v33, %v98_v31  ;;  %v279_v56 = vadd.f32 %v231_v34, %v99_v36  ;;  %v280_v57 = vadd.f32 %v232_v35, %v100_v37 }
  0xb0   :  { %v104_v45 = vld [vmem:[%s863_s1 + $0x138] sm:$0xff]  ;;  %v281_v58 = vadd.f32 %v233_v39, %v101_v38  ;;  %v282_v59 = vadd.f32 %v234_v40, %v102_v43  ;;  %v283_v60 = vadd.f32 %v235_v41, %v103_v44 }
  0xb1   :  { %301 = vst [vmem:[%s864_s4 + $0x40] sm:$0xff] %v253_v46  ;;  %302 = vst [vmem:[%s864_s4 + $0x48] sm:$0xff] %v254_v47  ;;  %v284_v61 = vadd.f32 %v236_v42, %v104_v45 }
  0xb2   :  { %303 = vst [vmem:[%s864_s4 + $0x50] sm:$0xff] %v255_v48  ;;  %304 = vst [vmem:[%s864_s4 + $0x58] sm:$0xff] %v256_v49 }
  0xb3   :  { %305 = vst [vmem:[%s864_s4 + $0x60] sm:$0xff] %v257_v50  ;;  %306 = vst [vmem:[%s864_s4 + $0x68] sm:$0xff] %v258_v51 }
  0xb4   :  { %307 = vst [vmem:[%s864_s4 + $0x70] sm:$0xff] %v259_v52  ;;  %308 = vst [vmem:[%s864_s4 + $0x78] sm:$0xff] %v260_v53 }
  0xb5   :  { %325 = vst [vmem:[%s864_s4 + $0x100] sm:$0xff] %v277_v54  ;;  %326 = vst [vmem:[%s864_s4 + $0x108] sm:$0xff] %v278_v55 }
  0xb6   :  { %327 = vst [vmem:[%s864_s4 + $0x110] sm:$0xff] %v279_v56  ;;  %328 = vst [vmem:[%s864_s4 + $0x118] sm:$0xff] %v280_v57 }
  0xb7   :  { %329 = vst [vmem:[%s864_s4 + $0x120] sm:$0xff] %v281_v58  ;;  %330 = vst [vmem:[%s864_s4 + $0x128] sm:$0xff] %v282_v59 }
  0xb8   :  { %331 = vst [vmem:[%s864_s4 + $0x130] sm:$0xff] %v283_v60  ;;  %332 = vst [vmem:[%s864_s4 + $0x138] sm:$0xff] %v284_v61 }

</bundles_post_ra>
